<compile_context>
chip_gen: v7x
topology: tpu7x:2x2x1
jax: 0.10.0
libtpu: 0.0.40
codegen_flags: <defaults>
</compile_context>

<pallas_src>
import functools
import math

import jax
import jax.numpy as jnp
from jax.experimental import pallas as pl
from jax.experimental.pallas import tpu as pltpu


LN_EPS = 1e-5


def _round_up(n, m):
    return ((n + m - 1) // m) * m


def _gelu_exact(x):
    # PyTorch nn.GELU() default = exact (erf) gelu; done in f32.
    return 0.5 * x * (1.0 + jax.lax.erf(x * (1.0 / math.sqrt(2.0))))


def adapter_head_kernel(
    x_ref,              # (TM, F_in)        bf16 token tile (feature axis unpadded)
    wb_ref, bb_ref,     # (F_in, H_pad) bf16, (1, H_pad) f32   backbone stand-in linear
    wd_ref, bd_ref,     # (H_pad, BOT_pad) bf16, (1, BOT_pad) f32  adapter down_proj
    wu_ref, bu_ref,     # (BOT_pad, H_pad) bf16, (1, H_pad) f32    adapter up_proj
    whf_ref, bhf_ref,   # (H_pad, C_pad) bf16, (1, C_pad) f32  head with LN affine folded in
    out_ref,            # (TM, C_pad) f32
    *, h_true, h_pad,
):
    x = x_ref[...]

    # Backbone stand-in: per-token linear projection to hidden size.
    # TODO(synk): the TimesFormer-1D backbone is an external module not defined
    # in the spec; a per-token linear projection stands in for it here.
    h = jnp.dot(x, wb_ref[...], preferred_element_type=jnp.float32) + bb_ref[...]

    # TaskAdapter (the active task's 'output' adapter). Dropout = identity (eval).
    d = jnp.dot(h.astype(jnp.bfloat16), wd_ref[...],
                preferred_element_type=jnp.float32) + bd_ref[...]
    d = _gelu_exact(d)
    u = jnp.dot(d.astype(jnp.bfloat16), wu_ref[...],
                preferred_element_type=jnp.float32) + bu_ref[...]
    r = u + h  # residual in f32; padded lanes of r are exactly zero by construction.

    # LayerNorm over the TRUE hidden width, stats in f32.
    # Padded lanes of r are exactly zero (zero-padded weights/biases), so there
    # rc == -mean; subtract that known contribution instead of masking with
    # iota/where (saves VALU work, bit-equivalent to the masked variance).
    inv_h = 1.0 / float(h_true)
    mean = jnp.sum(r, axis=-1, keepdims=True) * inv_h
    rc = r - mean
    pad_lanes = float(h_pad - h_true)
    var = (jnp.sum(rc * rc, axis=-1, keepdims=True) - pad_lanes * mean * mean) * inv_h
    ln = rc * jax.lax.rsqrt(var + LN_EPS)

    # Task head. gamma/beta are folded into whf/bhf; padded rows of whf are
    # zero, so garbage in padded ln lanes never reaches the logits.
    logits = jnp.dot(ln.astype(jnp.bfloat16), whf_ref[...],
                     preferred_element_type=jnp.float32) + bhf_ref[...]
    out_ref[...] = logits.astype(out_ref.dtype)


def _pad2(a, rows, cols, dtype=None):
    out = jnp.pad(a, ((0, rows - a.shape[0]), (0, cols - a.shape[1])))
    return out.astype(dtype) if dtype is not None else out


def _choose_tile_m(n, tile_m_req):
    """Single grid step for small N; otherwise 256-aligned tiles (default 512)."""
    n8 = _round_up(max(n, 1), 8)
    # A grid split is only worth the ~0.35us/step overhead when each step still
    # gets a large (>=256-row) M tile; otherwise run one step with all rows.
    if n8 <= 2 * 256:
        return n8
    tm = min(_round_up(tile_m_req, 256), _round_up(n8, 256))
    return max(tm, 256)


def _vmem_cap_bytes():
    """Generation-aware scoped-VMEM cap with headroom for compiler scratch."""
    try:
        info = pltpu.get_tpu_info()
        cap = getattr(info, "vmem_capacity_bytes", None)
        if cap:
            return int(cap) * 5 // 8          # ~62% of per-core physical VMEM
    except Exception:
        pass
    return 40 << 20                           # safe on every generation (v7x: 64 MiB/TC)


def timesformer_adapter_forward(x, params, *, tile_m=512):
    """x: (B, S, F_in) float32 -> logits (B, S, C) float32."""
    B, S, F_in = x.shape
    N = B * S
    H = params["wb"].shape[1]
    BOT = params["wd"].shape[1]
    C = params["wh"].shape[1]

    # Lane-dense padding of the hidden / bottleneck / class dims.
    H_pad = _round_up(H, 128)
    BOT_pad = _round_up(BOT, 128)
    C_pad = _round_up(C, 128)

    tile_m = _choose_tile_m(N, tile_m)
    N_pad = _round_up(N, tile_m)
    grid_m = N_pad // tile_m

    # x stays unpadded along the feature axis (block last dim == full array dim
    # is allowed), avoiding HBM read amplification; bf16 for the MXU.
    x2 = x.reshape(N, F_in)
    x_p = jnp.pad(x2, ((0, N_pad - N), (0, 0))).astype(jnp.bfloat16)

    # Zero-padded bf16 weights (zero padding keeps padded activation lanes
    # exactly zero, which the LN correction and folded head rely on); f32 biases.
    wb_p = _pad2(params["wb"], F_in, H_pad, jnp.bfloat16)
    bb_p = _pad2(params["bb"], 1, H_pad)
    wd_p = _pad2(params["wd"], H_pad, BOT_pad, jnp.bfloat16)
    bd_p = _pad2(params["bd"], 1, BOT_pad)
    wu_p = _pad2(params["wu"], BOT_pad, H_pad, jnp.bfloat16)
    bu_p = _pad2(params["bu"], 1, H_pad)

    # Fold LayerNorm affine (gamma, beta) into the head:
    #   logits = ((r-mean)*rsqrt(var)) @ (gamma[:,None]*wh) + (beta @ wh + bh)
    wh_f = params["gamma"].reshape(-1, 1) * params["wh"]
    bh_f = params["beta"].reshape(1, -1) @ params["wh"] + params["bh"]
    wh_fp = _pad2(wh_f, H_pad, C_pad, jnp.bfloat16)
    bh_fp = _pad2(bh_f, 1, C_pad)

    # VMEM budget: resident bf16 weights + f32 biases + double-buffered I/O
    # tiles + f32 intermediates, 2x headroom, generation-aware cap.
    bf16, f32 = 2, 4
    weights_b = (bf16 * (F_in * H_pad + H_pad * BOT_pad + BOT_pad * H_pad + H_pad * C_pad)
                 + f32 * (2 * H_pad + BOT_pad + C_pad))
    io_b = 2 * (bf16 * tile_m * F_in + f32 * tile_m * C_pad)
    interm_b = f32 * tile_m * (3 * H_pad + BOT_pad)
    vmem_limit = int(min(max(2 * (weights_b + io_b + interm_b), 8 << 20),
                         _vmem_cap_bytes()))

    # Grid-invariant weights: resident in VMEM for the whole call (no blocking,
    # no per-step double buffering).
    weight_spec = pl.BlockSpec(memory_space=pltpu.MemorySpace.VMEM)

    kernel = functools.partial(adapter_head_kernel, h_true=H, h_pad=H_pad)

    flops = 2 * N_pad * (F_in * H_pad + H_pad * BOT_pad + BOT_pad * H_pad + H_pad * C_pad)
    bytes_accessed = int(N_pad * F_in * bf16 + weights_b + N_pad * C_pad * f32)
    cost = pl.CostEstimate(flops=flops,
                           transcendentals=N_pad * BOT_pad,
                           bytes_accessed=bytes_accessed)

    out_p = pl.pallas_call(
        kernel,
        out_shape=jax.ShapeDtypeStruct((N_pad, C_pad), jnp.float32),
        grid_spec=pltpu.PrefetchScalarGridSpec(
            num_scalar_prefetch=0,
            grid=(grid_m,),
            in_specs=[
                pl.BlockSpec((tile_m, F_in), lambda i: (i, 0)),
                weight_spec, weight_spec,   # wb, bb
                weight_spec, weight_spec,   # wd, bd
                weight_spec, weight_spec,   # wu, bu
                weight_spec, weight_spec,   # wh (LN-folded), bh (LN-folded)
            ],
            out_specs=pl.BlockSpec((tile_m, C_pad), lambda i: (i, 0)),
        ),
        compiler_params=pltpu.CompilerParams(
            dimension_semantics=("parallel",),
            vmem_limit_bytes=vmem_limit,
        ),
        cost_estimate=cost,
    )(
        x_p,
        wb_p, bb_p,
        wd_p, bd_p,
        wu_p, bu_p,
        wh_fp, bh_fp,
    )
    return out_p[:N, :C].reshape(B, S, C)


def reference_forward(x, params):
    x = x.astype(jnp.float32)
    h = x @ params["wb"] + params["bb"]
    d = _gelu_exact(h @ params["wd"] + params["bd"])
    u = d @ params["wu"] + params["bu"]
    r = u + h
    mean = jnp.mean(r, axis=-1, keepdims=True)
    var = jnp.mean((r - mean) ** 2, axis=-1, keepdims=True)
    ln = (r - mean) * jax.lax.rsqrt(var + LN_EPS) * params["gamma"] + params["beta"]
    return ln @ params["wh"] + params["bh"]


def init_params(key, f_in, hidden, bottleneck, num_classes):
    ks = jax.random.split(key, 9)

    def uniform_fan(k, fan_in, shape):
        bound = math.sqrt(1.0 / fan_in)
        return jax.random.uniform(k, shape, jnp.float32, -bound, bound)

    wb = uniform_fan(ks[0], f_in, (f_in, hidden))
    bb = uniform_fan(ks[1], f_in, (1, hidden))
    wd = uniform_fan(ks[2], hidden, (hidden, bottleneck))
    bd = uniform_fan(ks[3], hidden, (1, bottleneck))
    wu = uniform_fan(ks[4], bottleneck, (bottleneck, hidden))
    bu = uniform_fan(ks[5], bottleneck, (1, hidden))
    # Module init is gamma=1 / beta=0 (nn.LayerNorm default); randomized
    # slightly here so the folded LN-affine path is actually exercised.
    gamma = 1.0 + 0.1 * jax.random.normal(ks[6], (hidden,), jnp.float32)
    beta = 0.1 * jax.random.normal(ks[7], (hidden,), jnp.float32)
    # head: xavier_uniform weight, zero bias (as in TimesFormerAdapterModel.__init__)
    xav = math.sqrt(6.0 / (hidden + num_classes))
    wh = jax.random.uniform(ks[8], (hidden, num_classes), jnp.float32, -xav, xav)
    bh = jnp.zeros((1, num_classes), jnp.float32)
    return dict(wb=wb, bb=bb, wd=wd, bd=bd, wu=wu, bu=bu,
                gamma=gamma, beta=beta, wh=wh, bh=bh)


if __name__ == "__main__":
    key = jax.random.PRNGKey(0)
    B, S, F_in = 2, 8, 16          # batch, sequence length, input feature dim
    HIDDEN = 32                    # backbone.config.hidden_size
    BOTTLENECK = 64                # TaskAdapter bottleneck_size
    TASK_CLASSES = {"classification": 5, "regression": 1}
    ACTIVE_TASK = "classification"

    kx, kp = jax.random.split(key)
    x = jax.random.normal(kx, (B, S, F_in), jnp.float32)
    params = init_params(kp, F_in, HIDDEN, BOTTLENECK, TASK_CLASSES[ACTIVE_TASK])

    logits = timesformer_adapter_forward(x, params)
    logits = jax.block_until_ready(logits)

    ref = reference_forward(x.reshape(B * S, F_in), params).reshape(B, S, -1)
    assert logits.shape == (B, S, TASK_CLASSES[ACTIVE_TASK])
    # bf16 MXU inputs -> looser tolerance vs the pure-f32 reference.
    assert jnp.allclose(logits, ref, atol=7.5e-2, rtol=7.5e-2), "mismatch vs reference"

    # TODO(synk): per-layer LoRA adapters (temporal/feature q/k/v/out, mlp) are
    # built in the PyTorch module but never used by forward(), so they are
    # omitted here.
    print("KERNEL_OK")
</pallas_src>

<mosaic_0001>
module attributes {stable_mosaic.version = 11 : i64} {
  func.func @adapter_head_kernel(%arg0: i32, %arg1: memref<16x16xbf16, #tpu.memory_space<vmem>>, %arg2: memref<16x128xbf16, #tpu.memory_space<vmem>>, %arg3: memref<1x128xf32, #tpu.memory_space<vmem>>, %arg4: memref<128x128xbf16, #tpu.memory_space<vmem>>, %arg5: memref<1x128xf32, #tpu.memory_space<vmem>>, %arg6: memref<128x128xbf16, #tpu.memory_space<vmem>>, %arg7: memref<1x128xf32, #tpu.memory_space<vmem>>, %arg8: memref<128x128xbf16, #tpu.memory_space<vmem>>, %arg9: memref<1x128xf32, #tpu.memory_space<vmem>>, %arg10: memref<16x128xf32, #tpu.memory_space<vmem>>) attributes {dimension_semantics = [#tpu.dimension_semantics<parallel>], iteration_bounds = array<i64: 1>, scalar_prefetch = 0 : i64, scratch_operands = 0 : i64, tpu.core_type = #tpu.core_type<tc>, window_params = [{transform_indices = @transform_0, window_bounds = array<i64: 16, 16>}, {pipeline_mode = #tpu.pipeline_mode<synchronous>, transform_indices = @transform_1, window_bounds = array<i64: 16, 128>}, {pipeline_mode = #tpu.pipeline_mode<synchronous>, transform_indices = @transform_2, window_bounds = array<i64: 1, 128>}, {pipeline_mode = #tpu.pipeline_mode<synchronous>, transform_indices = @transform_3, window_bounds = array<i64: 128, 128>}, {pipeline_mode = #tpu.pipeline_mode<synchronous>, transform_indices = @transform_4, window_bounds = array<i64: 1, 128>}, {pipeline_mode = #tpu.pipeline_mode<synchronous>, transform_indices = @transform_5, window_bounds = array<i64: 128, 128>}, {pipeline_mode = #tpu.pipeline_mode<synchronous>, transform_indices = @transform_6, window_bounds = array<i64: 1, 128>}, {pipeline_mode = #tpu.pipeline_mode<synchronous>, transform_indices = @transform_7, window_bounds = array<i64: 128, 128>}, {pipeline_mode = #tpu.pipeline_mode<synchronous>, transform_indices = @transform_8, window_bounds = array<i64: 1, 128>}, {transform_indices = @transform_9, window_bounds = array<i64: 16, 128>}]} {
    %c0 = arith.constant 0 : index
    %c0_0 = arith.constant 0 : index
    %0 = vector.load %arg1[%c0, %c0_0] : memref<16x16xbf16, #tpu.memory_space<vmem>>, vector<16x16xbf16>
    %c0_1 = arith.constant 0 : index
    %c0_2 = arith.constant 0 : index
    %1 = vector.load %arg2[%c0_1, %c0_2] : memref<16x128xbf16, #tpu.memory_space<vmem>>, vector<16x128xbf16>
    %cst = arith.constant dense<0.000000e+00> : vector<16x128xf32>
    %2 = tpu.matmul %0, %1, %cst {dimension_numbers = #tpu.dot_dimension_numbers<[1], [0], [0], [1], [0, 0, 1, 1], [], []>} : vector<16x16xbf16>, vector<16x128xbf16>, vector<16x128xf32> -> vector<16x128xf32>
    %c0_3 = arith.constant 0 : index
    %c0_4 = arith.constant 0 : index
    %3 = vector.load %arg3[%c0_3, %c0_4] : memref<1x128xf32, #tpu.memory_space<vmem>>, vector<1x128xf32>
    %4 = vector.broadcast %3 : vector<1x128xf32> to vector<16x128xf32>
    %5 = arith.addf %2, %4 : vector<16x128xf32>
    %6 = arith.truncf %5 : vector<16x128xf32> to vector<16x128xbf16>
    %c0_5 = arith.constant 0 : index
    %c0_6 = arith.constant 0 : index
    %7 = vector.load %arg4[%c0_5, %c0_6] : memref<128x128xbf16, #tpu.memory_space<vmem>>, vector<128x128xbf16>
    %cst_7 = arith.constant dense<0.000000e+00> : vector<16x128xf32>
    %8 = tpu.matmul %6, %7, %cst_7 {dimension_numbers = #tpu.dot_dimension_numbers<[1], [0], [0], [1], [0, 0, 1, 1], [], []>} : vector<16x128xbf16>, vector<128x128xbf16>, vector<16x128xf32> -> vector<16x128xf32>
    %c0_8 = arith.constant 0 : index
    %c0_9 = arith.constant 0 : index
    %9 = vector.load %arg5[%c0_8, %c0_9] : memref<1x128xf32, #tpu.memory_space<vmem>>, vector<1x128xf32>
    %10 = vector.broadcast %9 : vector<1x128xf32> to vector<16x128xf32>
    %11 = arith.addf %8, %10 : vector<16x128xf32>
    %cst_10 = arith.constant 5.000000e-01 : f32
    %12 = vector.broadcast %cst_10 : f32 to vector<16x128xf32>
    %13 = arith.mulf %12, %11 : vector<16x128xf32>
    %cst_11 = arith.constant 0.707106769 : f32
    %14 = vector.broadcast %cst_11 : f32 to vector<16x128xf32>
    %15 = arith.mulf %11, %14 : vector<16x128xf32>
    %16 = math.erf %15 : vector<16x128xf32>
    %cst_12 = arith.constant 1.000000e+00 : f32
    %17 = vector.broadcast %cst_12 : f32 to vector<16x128xf32>
    %18 = arith.addf %17, %16 : vector<16x128xf32>
    %19 = arith.mulf %13, %18 : vector<16x128xf32>
    %20 = arith.truncf %19 : vector<16x128xf32> to vector<16x128xbf16>
    %c0_13 = arith.constant 0 : index
    %c0_14 = arith.constant 0 : index
    %21 = vector.load %arg6[%c0_13, %c0_14] : memref<128x128xbf16, #tpu.memory_space<vmem>>, vector<128x128xbf16>
    %cst_15 = arith.constant dense<0.000000e+00> : vector<16x128xf32>
    %22 = tpu.matmul %20, %21, %cst_15 {dimension_numbers = #tpu.dot_dimension_numbers<[1], [0], [0], [1], [0, 0, 1, 1], [], []>} : vector<16x128xbf16>, vector<128x128xbf16>, vector<16x128xf32> -> vector<16x128xf32>
    %c0_16 = arith.constant 0 : index
    %c0_17 = arith.constant 0 : index
    %23 = vector.load %arg7[%c0_16, %c0_17] : memref<1x128xf32, #tpu.memory_space<vmem>>, vector<1x128xf32>
    %24 = vector.broadcast %23 : vector<1x128xf32> to vector<16x128xf32>
    %25 = arith.addf %22, %24 : vector<16x128xf32>
    %26 = arith.addf %25, %5 : vector<16x128xf32>
    %cst_18 = arith.constant dense<0.000000e+00> : vector<16xf32>
    %27 = vector.multi_reduction <add>, %26, %cst_18 [1] : vector<16x128xf32> to vector<16xf32>
    %28 = vector.shape_cast %27 : vector<16xf32> to vector<16x1xf32>
    %cst_19 = arith.constant 3.125000e-02 : f32
    %29 = vector.broadcast %cst_19 : f32 to vector<16x1xf32>
    %30 = arith.mulf %28, %29 : vector<16x1xf32>
    %31 = vector.broadcast %30 : vector<16x1xf32> to vector<16x128xf32>
    %32 = arith.subf %26, %31 : vector<16x128xf32>
    %33 = arith.mulf %32, %32 : vector<16x128xf32>
    %cst_20 = arith.constant dense<0.000000e+00> : vector<16xf32>
    %34 = vector.multi_reduction <add>, %33, %cst_20 [1] : vector<16x128xf32> to vector<16xf32>
    %35 = vector.shape_cast %34 : vector<16xf32> to vector<16x1xf32>
    %cst_21 = arith.constant 9.600000e+01 : f32
    %36 = vector.broadcast %cst_21 : f32 to vector<16x1xf32>
    %37 = arith.mulf %36, %30 : vector<16x1xf32>
    %38 = arith.mulf %37, %30 : vector<16x1xf32>
    %39 = arith.subf %35, %38 : vector<16x1xf32>
    %cst_22 = arith.constant 3.125000e-02 : f32
    %40 = vector.broadcast %cst_22 : f32 to vector<16x1xf32>
    %41 = arith.mulf %39, %40 : vector<16x1xf32>
    %cst_23 = arith.constant 9.99999974E-6 : f32
    %42 = vector.broadcast %cst_23 : f32 to vector<16x1xf32>
    %43 = arith.addf %41, %42 : vector<16x1xf32>
    %44 = math.rsqrt %43 : vector<16x1xf32>
    %45 = vector.broadcast %44 : vector<16x1xf32> to vector<16x128xf32>
    %46 = arith.mulf %32, %45 : vector<16x128xf32>
    %47 = arith.truncf %46 : vector<16x128xf32> to vector<16x128xbf16>
    %c0_24 = arith.constant 0 : index
    %c0_25 = arith.constant 0 : index
    %48 = vector.load %arg8[%c0_24, %c0_25] : memref<128x128xbf16, #tpu.memory_space<vmem>>, vector<128x128xbf16>
    %cst_26 = arith.constant dense<0.000000e+00> : vector<16x128xf32>
    %49 = tpu.matmul %47, %48, %cst_26 {dimension_numbers = #tpu.dot_dimension_numbers<[1], [0], [0], [1], [0, 0, 1, 1], [], []>} : vector<16x128xbf16>, vector<128x128xbf16>, vector<16x128xf32> -> vector<16x128xf32>
    %c0_27 = arith.constant 0 : index
    %c0_28 = arith.constant 0 : index
    %50 = vector.load %arg9[%c0_27, %c0_28] : memref<1x128xf32, #tpu.memory_space<vmem>>, vector<1x128xf32>
    %51 = vector.broadcast %50 : vector<1x128xf32> to vector<16x128xf32>
    %52 = arith.addf %49, %51 : vector<16x128xf32>
    %c0_29 = arith.constant 0 : index
    %c0_30 = arith.constant 0 : index
    %53 = vector.load %arg10[%c0_29, %c0_30] : memref<16x128xf32, #tpu.memory_space<vmem>>, vector<16x128xf32>
    tpu.vector_store %arg10[%c0_29, %c0_30], %52 {strides = array<i32>} : memref<16x128xf32, #tpu.memory_space<vmem>>, vector<16x128xf32>,
    return
  }
  func.func @transform_0(%arg0: i32) -> (i32, i32) {
    %c0_i32 = arith.constant 0 : i32
    %c0_i32_0 = arith.constant 0 : i32
    return %arg0, %c0_i32 : i32, i32
  }
  func.func @transform_1(%arg0: i32) -> (i32, i32) {
    %c0_i32 = arith.constant 0 : i32
    %c0_i32_0 = arith.constant 0 : i32
    %c0_i32_1 = arith.constant 0 : i32
    return %c0_i32, %c0_i32_0 : i32, i32
  }
  func.func @transform_2(%arg0: i32) -> (i32, i32) {
    %c0_i32 = arith.constant 0 : i32
    %c0_i32_0 = arith.constant 0 : i32
    %c0_i32_1 = arith.constant 0 : i32
    return %c0_i32, %c0_i32_0 : i32, i32
  }
  func.func @transform_3(%arg0: i32) -> (i32, i32) {
    %c0_i32 = arith.constant 0 : i32
    %c0_i32_0 = arith.constant 0 : i32
    %c0_i32_1 = arith.constant 0 : i32
    return %c0_i32, %c0_i32_0 : i32, i32
  }
  func.func @transform_4(%arg0: i32) -> (i32, i32) {
    %c0_i32 = arith.constant 0 : i32
    %c0_i32_0 = arith.constant 0 : i32
    %c0_i32_1 = arith.constant 0 : i32
    return %c0_i32, %c0_i32_0 : i32, i32
  }
  func.func @transform_5(%arg0: i32) -> (i32, i32) {
    %c0_i32 = arith.constant 0 : i32
    %c0_i32_0 = arith.constant 0 : i32
    %c0_i32_1 = arith.constant 0 : i32
    return %c0_i32, %c0_i32_0 : i32, i32
  }
  func.func @transform_6(%arg0: i32) -> (i32, i32) {
    %c0_i32 = arith.constant 0 : i32
    %c0_i32_0 = arith.constant 0 : i32
    %c0_i32_1 = arith.constant 0 : i32
    return %c0_i32, %c0_i32_0 : i32, i32
  }
  func.func @transform_7(%arg0: i32) -> (i32, i32) {
    %c0_i32 = arith.constant 0 : i32
    %c0_i32_0 = arith.constant 0 : i32
    %c0_i32_1 = arith.constant 0 : i32
    return %c0_i32, %c0_i32_0 : i32, i32
  }
  func.func @transform_8(%arg0: i32) -> (i32, i32) {
    %c0_i32 = arith.constant 0 : i32
    %c0_i32_0 = arith.constant 0 : i32
    %c0_i32_1 = arith.constant 0 : i32
    return %c0_i32, %c0_i32_0 : i32, i32
  }
  func.func @transform_9(%arg0: i32) -> (i32, i32) {
    %c0_i32 = arith.constant 0 : i32
    %c0_i32_0 = arith.constant 0 : i32
    return %arg0, %c0_i32 : i32, i32
  }
}

</mosaic_0001>

<bundles_post_ra>
// kernel: tpu_custom_call.1
= control target key start
LH: loop header
LB: loop body
LE: loop exit
PB: predicated region body
PF: predicated region fallthrough
CT: control target
= control target key end

     0   :  { %14 = vsyncpa [#allocation3], 0  ;;  %s1089_s0 = inlined_call_operand.hbm [shape: bf16[16,16], index: 0, kind: input, shape index: {}]   ;;  %s1090_s1 = inlined_call_operand.hbm [shape: bf16[16,128], index: 1, kind: input, shape index: {}]   ;;  %s1091_s2 = inlined_call_operand.vmem [shape: f32[1,128], index: 2, kind: input, shape index: {}]   ;;  %s1092_s3 = inlined_call_operand.hbm [shape: bf16[128,128], index: 3, kind: input, shape index: {}]   ;;  %s1093_s4 = inlined_call_operand.vmem [shape: f32[1,128], index: 4, kind: input, shape index: {}]   ;;  %s1094_s5 = inlined_call_operand.hbm [shape: bf16[128,128], index: 5, kind: input, shape index: {}]   ;;  %s1095_s6 = inlined_call_operand.vmem [shape: f32[1,128], index: 6, kind: input, shape index: {}]   ;;  %s1096_s7 = inlined_call_operand.hbm [shape: bf16[128,128], index: 7, kind: input, shape index: {}]   ;;  %s1097_s8 = inlined_call_operand.vmem [shape: f32[1,128], index: 8, kind: input, shape index: {}]   ;;  %s1098_s9 = inlined_call_operand.hbm [shape: f32[16,128], index: 9, kind: output, shape index: {}]  }
   0x1   :  { %15 = vsyncpa [#allocation6], 0 }
   0x2   :  { %16 = vsyncpa [#allocation9], 0 }
   0x3   :  { %17 = vsyncpa [#allocation4], 0  ;;  %s881_s30 = smov [#allocation5]   ;;  %s882_s11 = smov [#allocation8]  }
   0x4   :  { %s35_s10 = sshll.u32 %s881_s30, 4  ;;  %s63_s12 = sshll.u32 %s882_s11, 4  ;;  %s36_s10 = int_to_ptr.vmem [resolvable:$true] %s35_s10  ;;  %s943_s12 = int_to_ptr.vmem [resolvable:$true] %s63_s12 }
   0x5   :  { %s741_s15 = scalar_lea.hbm %s1090_s1, 128 }
   0x6   :  { %p742_p0 = scmp.ne.s32.totalorder %s1090_s1, %s741_s15  ;;  %p745_p1 = scmp.lt.u32.totalorder %s741_s15, %s1090_s1 }
   0x8   :  { %p747_p2 = pnand %p745_p1, %p742_p0 }
   0xa   :  { %750 = shalt.err (!%p747_p2)
}
   0xb   :  { %s751_s20 = scalar_lea.vmem %s36_s10, 128  ;;  %p756_p4 = scmp.lt.s32.totalorder %s36_s10, %s36_s10 }
   0xc   :  { %p752_p3 = scmp.ne.s32.totalorder %s36_s10, %s751_s20  ;;  %p757_p5 = scmp.lt.s32.totalorder %s751_s20, %s751_s20 }
   0xe   :  { %p758_p6 = por %p757_p5, %p756_p4 }
  0x10   :  { %p759_p7 = pnand %p758_p6, %p752_p3 }
  0x12   :  { %762 = shalt.err (!%p759_p7)
}
  0x13   :  { %s883_s21 = smov 64   ;;  %s884_s22 = smov 4  }
  0x14   :  { %41 = dma.hbm_to_vmem [thread:$0]  %s1090_s1, 128, %s36_s10, [#allocation6], %s883_s21, %s883_s21, %s884_s22  }
  0x15   :  { %s763_s27 = scalar_lea.hbm %s1094_s5, 1024 }
  0x16   :  { %p764_p8 = scmp.ne.s32.totalorder %s1094_s5, %s763_s27  ;;  %p767_p9 = scmp.lt.u32.totalorder %s763_s27, %s1094_s5 }
  0x18   :  { %p769_p10 = pnand %p767_p9, %p764_p8 }
  0x1a   :  { %772 = shalt.err (!%p769_p10)
}
  0x1b   :  { %s773_s13 = scalar_lea.vmem %s943_s12, 1024  ;;  %p778_p12 = scmp.lt.s32.totalorder %s943_s12, %s943_s12 }
  0x1c   :  { %p774_p11 = scmp.ne.s32.totalorder %s943_s12, %s773_s13  ;;  %p779_p13 = scmp.lt.s32.totalorder %s773_s13, %s773_s13 }
  0x1e   :  { %p780_p0 = por %p779_p13, %p778_p12 }
  0x20   :  { %p781_p1 = pnand %p780_p0, %p774_p11 }
  0x22   :  { %784 = shalt.err (!%p781_p1)
}
  0x23   :  { %69 = dma.hbm_to_vmem [thread:$0]  %s1094_s5, 1024, %s943_s12, [#allocation9], %s883_s21, %s883_s21, %s884_s22  }
  0x24   :  { %s885_s14 = smov [#allocation2]   ;;  %s886_s16 = smov [#allocation7]  }
  0x25   :  { %s23_s15 = sshll.u32 %s885_s14, 4  ;;  %s49_s17 = sshll.u32 %s886_s16, 4  ;;  %s24_s15 = int_to_ptr.vmem [resolvable:$true] %s23_s15  ;;  %s980_s17 = int_to_ptr.vmem [resolvable:$true] %s49_s17 }
  0x26   :  { %s785_s20 = scalar_lea.hbm %s1089_s0, 128 }
  0x27   :  { %p786_p2 = scmp.ne.s32.totalorder %s1089_s0, %s785_s20  ;;  %p789_p3 = scmp.lt.u32.totalorder %s785_s20, %s1089_s0 }
  0x29   :  { %p791_p4 = pnand %p789_p3, %p786_p2 }
  0x2b   :  { %794 = shalt.err (!%p791_p4)
}
  0x2c   :  { %s795_s5 = scalar_lea.vmem %s24_s15, 128  ;;  %p800_p6 = scmp.lt.s32.totalorder %s24_s15, %s24_s15 }
  0x2d   :  { %p796_p5 = scmp.ne.s32.totalorder %s24_s15, %s795_s5  ;;  %p801_p7 = scmp.lt.s32.totalorder %s795_s5, %s795_s5 }
  0x2f   :  { %p802_p8 = por %p801_p7, %p800_p6 }
  0x31   :  { %p803_p9 = pnand %p802_p8, %p796_p5 }
  0x33   :  { %806 = shalt.err (!%p803_p9)
}
  0x34   :  { %29 = dma.hbm_to_vmem [thread:$0]  %s1089_s0, 128, %s24_s15, [#allocation3], %s883_s21, %s883_s21, %s884_s22  }
  0x35   :  { %s807_s30 = scalar_lea.hbm %s1092_s3, 1024 }
  0x36   :  { %p808_p10 = scmp.ne.s32.totalorder %s1092_s3, %s807_s30  ;;  %p811_p11 = scmp.lt.u32.totalorder %s807_s30, %s1092_s3 }
  0x38   :  { %p813_p12 = pnand %p811_p11, %p808_p10 }
  0x3a   :  { %816 = shalt.err (!%p813_p12)
}
  0x3b   :  { %s817_s14 = scalar_lea.vmem %s980_s17, 1024  ;;  %p822_p0 = scmp.lt.s32.totalorder %s980_s17, %s980_s17 }
  0x3c   :  { %p818_p13 = scmp.ne.s32.totalorder %s980_s17, %s817_s14  ;;  %p823_p1 = scmp.lt.s32.totalorder %s817_s14, %s817_s14 }
  0x3e   :  { %p824_p2 = por %p823_p1, %p822_p0 }
  0x40   :  { %p825_p3 = pnand %p824_p2, %p818_p13 }
  0x42   :  { %828 = shalt.err (!%p825_p3)
}
  0x43   :  { %55 = dma.hbm_to_vmem [thread:$0]  %s1092_s3, 1024, %s980_s17, [#allocation6], %s883_s21, %s883_s21, %s884_s22  }
  0x44   :  { %s887_s16 = smov [#allocation10]   ;;  %s829_s23 = scalar_lea.hbm %s1096_s7, 1024 }
  0x45   :  { %s77_s18 = sshll.u32 %s887_s16, 4  ;;  %p830_p4 = scmp.ne.s32.totalorder %s1096_s7, %s829_s23  ;;  %s78_s18 = int_to_ptr.vmem [resolvable:$true] %s77_s18 }
  0x46   :  { %p833_p5 = scmp.lt.u32.totalorder %s829_s23, %s1096_s7 }
  0x48   :  { %p835_p6 = pnand %p833_p5, %p830_p4 }
  0x4a   :  { %838 = shalt.err (!%p835_p6)
}
  0x4b   :  { %s839_s12 = scalar_lea.vmem %s78_s18, 1024  ;;  %p844_p8 = scmp.lt.s32.totalorder %s78_s18, %s78_s18 }
  0x4c   :  { %p840_p7 = scmp.ne.s32.totalorder %s78_s18, %s839_s12  ;;  %p845_p9 = scmp.lt.s32.totalorder %s839_s12, %s839_s12 }
  0x4e   :  { %p846_p10 = por %p845_p9, %p844_p8 }
  0x50   :  { %p847_p11 = pnand %p846_p10, %p840_p7 }
  0x52   :  { %850 = shalt.err (!%p847_p11)
}
  0x53   :  { %83 = dma.hbm_to_vmem [thread:$0]  %s1096_s7, 1024, %s78_s18, [#allocation9], %s883_s21, %s883_s21, %s884_s22  }
  0x54   :  { %873 = dma.done.wait [#allocation3], 128  }
  0x55   :  { %874 = vsyncadd [#allocation3], 4294967168 }
  0x56   :  { %875 = dma.done.wait [#allocation6], 1152  }
  0x57   :  { %876 = vsyncadd [#allocation6], 4294966144 }
  0x58   :  { %877 = dma.done.wait [#allocation9], 2048  }
  0x59   :  { %878 = vsyncadd [#allocation9], 4294965248  ;;  %v888_v0 = vmov 0.0   ;;  %vm889_vm0 = vmmov 0   ;;  %v707_v1 = vld [vmem:[#allocation5] sm:$0xff]   ;;  %v708_v2 = vld [vmem:[#allocation2] sm:$0xff]  }
  0x5a   :  { %629 = vmatprep.subr.bf16.mxu0 %v888_v0  ;;  %631 = vmatprep.mubr.msk.bf16.mxu0 %vm889_vm0, %v888_v0  ;;  %vm124_vm1 = vcmask 130048   ;;  %v709_v3 = vld [vmem:[#allocation7] sm:$0xff]   ;;  %v710_v4 = vld [vmem:[#allocation7 + $0x8] sm:$0xff]   ;;  %v711_v5 = vld [vmem:[#allocation7 + $0x10] sm:$0xff]   ;;  %s890_s29 = smov [#allocation11]  }
  0x5b   :  { %635 = vmatprep.subr.bf16.mxu1 %v888_v0  ;;  %651 = vmatprep.mubr.msk.bf16.mxu1 %vm889_vm0, %v888_v0  ;;  %v712_v6 = vld [vmem:[#allocation7 + $0x18] sm:$0xff]   ;;  %v713_v7 = vld [vmem:[#allocation7 + $0x20] sm:$0xff]   ;;  %v714_v8 = vld [vmem:[#allocation7 + $0x28] sm:$0xff]   ;;  %s555_s30 = sshll.u32 %s890_s29, 4  ;;  %s556_s30 = int_to_ptr.vmem [resolvable:$true] %s555_s30 }
  0x5c   :  { %630 = vmatpush3.bf16.msra.mxu0 %v707_v1  ;;  %636 = vmatpush3.bf16.msra.mxu1 %v709_v3  ;;  %v715_v9 = vld [vmem:[#allocation7 + $0x30] sm:$0xff]   ;;  %v716_v10 = vld [vmem:[#allocation7 + $0x38] sm:$0xff]   ;;  %v717_v11 = vld [vmem:[#allocation8] sm:$0xff]   ;;  %s851_s11 = scalar_lea.vmem %s556_s30, 256  ;;  %p856_p13 = scmp.lt.s32.totalorder %s556_s30, %s556_s30 }
  0x5d   :  { %655 = vmatprep.subr.bf16.mxu0 %v888_v0  ;;  %637 = vmatprep.subr.bf16.mxu1 %v888_v0  ;;  %v718_v12 = vld [vmem:[#allocation8 + $0x8] sm:$0xff]   ;;  %v569_v13 = vld [vmem:[%s1091_s2] ss:$0 sm:$0xff]  ;;  %v720_v22 = vld [vmem:[#allocation8 + $0x18] sm:$0xff]   ;;  %p852_p12 = scmp.ne.s32.totalorder %s556_s30, %s851_s11  ;;  %p857_p0 = scmp.lt.s32.totalorder %s851_s11, %s851_s11 }
  0x5e   :  { %v719_v21 = vld [vmem:[#allocation8 + $0x10] sm:$0xff]   ;;  %v721_v23 = vld [vmem:[#allocation8 + $0x20] sm:$0xff]   ;;  %v722_v24 = vld [vmem:[#allocation8 + $0x28] sm:$0xff]  }
  0x5f   :  { %632 = vmatmul.mubr.msk.bf16.vlgmr.msra.gmra.mrb[0].mxu0 %vm124_vm1, %v708_v2  ;;  %v723_v25 = vld [vmem:[#allocation8 + $0x30] sm:$0xff]   ;;  %v724_v26 = vld [vmem:[#allocation8 + $0x38] sm:$0xff]   ;;  %v725_v54 = vld [vmem:[#allocation10] sm:$0xff]   ;;  %p858_p1 = por %p857_p0, %p856_p13 }
  0x60   :  { %671 = vmatprep.mubr.msk.bf16.mxu0 %vm889_vm0, %v888_v0  ;;  %638 = vmatpush3.bf16.msra.mxu1 %v710_v4  ;;  %v573_v27 = vld [vmem:[%s1093_s4] ss:$0 sm:$0xff]  ;;  %v726_v55 = vld [vmem:[#allocation10 + $0x8] sm:$0xff]   ;;  %v728_v2 = vld [vmem:[#allocation10 + $0x18] sm:$0xff]  }
  0x61   :  { %639 = vmatprep.subr.bf16.mxu1 %v888_v0  ;;  %656 = vmatpush3.bf16.msra.mxu0 %v717_v11  ;;  %v582_v45 = vld [vmem:[%s1095_s6] ss:$0 sm:$0xff]  ;;  %v729_v3 = vld [vmem:[#allocation10 + $0x20] sm:$0xff]   ;;  %v730_v4 = vld [vmem:[#allocation10 + $0x28] sm:$0xff]   ;;  %p859_p2 = pnand %p858_p1, %p852_p12 }
  0x62   :  { %657 = vmatprep.subr.bf16.mxu0 %v888_v0  ;;  %v727_v1 = vld [vmem:[#allocation10 + $0x10] sm:$0xff]  }
  0x64   :  { %640 = vmatpush3.bf16.msra.mxu1 %v711_v5  ;;  %v731_v5 = vld [vmem:[#allocation10 + $0x30] sm:$0xff]  }
  0x65   :  { %641 = vmatprep.subr.bf16.mxu1 %v888_v0  ;;  %658 = vmatpush3.bf16.msra.mxu0 %v718_v12 }
  0x66   :  { %659 = vmatprep.subr.bf16.mxu0 %v888_v0 }
  0x68   :  { %642 = vmatpush3.bf16.msra.mxu1 %v712_v6  ;;  %v732_v6 = vld [vmem:[#allocation10 + $0x38] sm:$0xff]  }
  0x69   :  { %643 = vmatprep.subr.bf16.mxu1 %v888_v0  ;;  %660 = vmatpush3.bf16.msra.mxu0 %v719_v21 }
  0x6a   :  { %661 = vmatprep.subr.bf16.mxu0 %v888_v0 }
  0x6c   :  { %644 = vmatpush3.bf16.msra.mxu1 %v713_v7 }
  0x6d   :  { %645 = vmatprep.subr.bf16.mxu1 %v888_v0  ;;  %662 = vmatpush3.bf16.msra.mxu0 %v720_v22 }
  0x6e   :  { %663 = vmatprep.subr.bf16.mxu0 %v888_v0 }
  0x70   :  { %646 = vmatpush3.bf16.msra.mxu1 %v714_v8 }
  0x71   :  { %647 = vmatprep.subr.bf16.mxu1 %v888_v0  ;;  %664 = vmatpush3.bf16.msra.mxu0 %v721_v23  ;;  %v591_v23 = vld [vmem:[%s1097_s8] ss:$0 sm:$0xff] }
  0x72   :  { %665 = vmatprep.subr.bf16.mxu0 %v888_v0 }
  0x74   :  { %648 = vmatpush3.bf16.msra.mxu1 %v715_v9 }
  0x75   :  { %649 = vmatprep.subr.bf16.mxu1 %v888_v0  ;;  %666 = vmatpush3.bf16.msra.mxu0 %v722_v24 }
  0x76   :  { %667 = vmatprep.subr.bf16.mxu0 %v888_v0 }
  0x78   :  { %650 = vmatpush3.bf16.msra.mxu1 %v716_v10 }
  0x79   :  { %675 = vmatprep.subr.bf16.mxu1 %v888_v0  ;;  %668 = vmatpush3.bf16.msra.mxu0 %v723_v25 }
  0x7a   :  { %669 = vmatprep.subr.bf16.mxu0 %v888_v0 }
  0x7d   :  { %670 = vmatpush3.bf16.msra.mxu0 %v724_v26 }
 0x132   :  { %v162_v14 = vpop.f32.mrb[0].mxu0 }
 0x133   :  { %v633_v15 = vpop.f32.mrb[1].mxu0  ;;  %v163_v17 = vadd.f32 %v569_v13, %v162_v14 }
 0x134   :  { %v165_v16 = vpop.f32.mrb[2].mxu0 }
 0x135   :  { %v166_v18 = vadd.f32 %v569_v13, %v165_v16  ;;  %v634_v19 = vpop.f32.mrb[3].mxu0 }
 0x137   :  { %v169_v20 = vpack.c.bf16 %v166_v18, %v163_v17 }
 0x139   :  { %652 = vmatmul.mubr.bf16.vlgmr.msra.gmra.mrb[0].mxu1 %v169_v20 }
 0x13a   :  { %691 = vmatprep.mubr.msk.bf16.mxu1 %vm889_vm0, %v888_v0  ;;  %676 = vmatpush3.bf16.msra.mxu1 %v725_v54 }
 0x13b   :  { %677 = vmatprep.subr.bf16.mxu1 %v888_v0 }
 0x13e   :  { %678 = vmatpush3.bf16.msra.mxu1 %v726_v55 }
 0x13f   :  { %679 = vmatprep.subr.bf16.mxu1 %v888_v0 }
 0x142   :  { %680 = vmatpush3.bf16.msra.mxu1 %v727_v1 }
 0x143   :  { %681 = vmatprep.subr.bf16.mxu1 %v888_v0 }
 0x146   :  { %682 = vmatpush3.bf16.msra.mxu1 %v728_v2 }
 0x147   :  { %683 = vmatprep.subr.bf16.mxu1 %v888_v0 }
 0x14a   :  { %684 = vmatpush3.bf16.msra.mxu1 %v729_v3 }
 0x14b   :  { %685 = vmatprep.subr.bf16.mxu1 %v888_v0 }
 0x14e   :  { %686 = vmatpush3.bf16.msra.mxu1 %v730_v4 }
 0x14f   :  { %687 = vmatprep.subr.bf16.mxu1 %v888_v0 }
 0x152   :  { %688 = vmatpush3.bf16.msra.mxu1 %v731_v5 }
 0x153   :  { %689 = vmatprep.subr.bf16.mxu1 %v888_v0 }
 0x156   :  { %690 = vmatpush3.bf16.msra.mxu1 %v732_v6 }
 0x20c   :  { %v275_v28 = vpop.f32.mrb[0].mxu1 }
 0x20d   :  { %v276_v29 = vadd.f32 %v573_v27, %v275_v28  ;;  %v653_v30 = vpop.f32.mrb[1].mxu1 }
 0x20e   :  { %v278_v31 = vpop.f32.mrb[2].mxu1 }
 0x20f   :  { %v284_v32 = vmul.f32 0.70710677, %v276_v29  ;;  %v279_v33 = vadd.f32 %v573_v27, %v278_v31  ;;  %v654_v34 = vpop.f32.mrb[3].mxu1  ;;  %v282_v39 = vmul.f32 0.5, %v276_v29 }
 0x211   :  { %733 = verf.f32 %v284_v32  ;;  %v285_v35 = vmul.f32 0.70710677, %v279_v33  ;;  %v283_v40 = vmul.f32 0.5, %v279_v33 }
 0x213   :  { %735 = verf.f32 %v285_v35 }
 0x21b   :  { %v734_v36 = vpop.eup %733 }
 0x21c   :  { %v288_v37 = vadd.f32 1.0, %v734_v36 }
 0x21d   :  { %v736_v38 = vpop.eup %735 }
 0x21e   :  { %v289_v41 = vadd.f32 1.0, %v736_v38  ;;  %v290_v42 = vmul.f32 %v288_v37, %v282_v39 }
 0x220   :  { %v291_v43 = vmul.f32 %v289_v41, %v283_v40 }
 0x222   :  { %v292_v44 = vpack.c.bf16 %v291_v43, %v290_v42 }
 0x224   :  { %672 = vmatmul.mubr.bf16.vlgmr.msra.gmra.mrb[4].mxu0 %v292_v44 }
 0x2f7   :  { %v398_v46 = vpop.f32.mrb[4].mxu0 }
 0x2f8   :  { %v399_v47 = vadd.f32 %v582_v45, %v398_v46  ;;  %v673_v48 = vpop.f32.mrb[5].mxu0 }
 0x2f9   :  { %v401_v49 = vpop.f32.mrb[6].mxu0 }
 0x2fa   :  { %v402_v50 = vadd.f32 %v582_v45, %v401_v49  ;;  %v674_v51 = vpop.f32.mrb[7].mxu0  ;;  %v405_v52 = vadd.f32 %v399_v47, %v163_v17 }
 0x2fc   :  { %407 = vadd.xlane.f32.xlu0 %v405_v52  ;;  %v406_v53 = vadd.f32 %v402_v50, %v166_v18 }
 0x300   :  { %409 = vadd.xlane.f32.xlu0 %v406_v53 }
 0x389   :  { %v408_v56 = vpop.xlane.xlu0 %407 }
 0x38a   :  { %v411_v57 = vmul.f32 0.03125, %v408_v56 }
 0x38c   :  { %v413_v58 = vsub.f32 %v405_v52, %v411_v57  ;;  %v421_v7 = vmul.f32 96.0, %v411_v57 }
 0x38d   :  { %v410_v59 = vpop.xlane.xlu0 %409 }
 0x38e   :  { %v412_v60 = vmul.f32 0.03125, %v410_v59  ;;  %v415_v61 = vmul.f32 %v413_v58, %v413_v58  ;;  %v423_v9 = vmul.f32 %v421_v7, %v411_v57 }
 0x390   :  { %417 = vadd.xlane.f32.xlu1 %v415_v61  ;;  %v414_v62 = vsub.f32 %v406_v53, %v412_v60  ;;  %v422_v8 = vmul.f32 96.0, %v412_v60 }
 0x392   :  { %v416_v63 = vmul.f32 %v414_v62, %v414_v62  ;;  %v424_v13 = vmul.f32 %v422_v8, %v412_v60 }
 0x394   :  { %419 = vadd.xlane.f32.xlu1 %v416_v63 }
 0x41d   :  { %v418_v10 = vpop.xlane.xlu1 %417 }
 0x41e   :  { %v425_v11 = vsub.f32 %v418_v10, %v423_v9 }
 0x420   :  { %v427_v12 = vmul.f32 0.03125, %v425_v11 }
 0x421   :  { %v420_v14 = vpop.xlane.xlu1 %419 }
 0x422   :  { %v429_v15 = vadd.f32 1e-05, %v427_v12  ;;  %v426_v16 = vsub.f32 %v420_v14, %v424_v13 }
 0x424   :  { %v428_v17 = vmul.f32 0.03125, %v426_v16  ;;  %737 = vrsqrt.f32 %v429_v15 }
 0x426   :  { %v430_v18 = vadd.f32 1e-05, %v428_v17 }
 0x428   :  { %739 = vrsqrt.f32 %v430_v18 }
 0x42e   :  { %v738_v19 = vpop.eup %737 }
 0x42f   :  { %v433_v21 = vmul.f32 %v738_v19, %v413_v58 }
 0x432   :  { %v740_v20 = vpop.eup %739 }
 0x433   :  { %v434_v22 = vmul.f32 %v740_v20, %v414_v62 }
 0x435   :  { %v435_v0 = vpack.c.bf16 %v434_v22, %v433_v21 }
 0x437   :  { %692 = vmatmul.mubr.bf16.vlgmr.msra.gmra.mrb[4].mxu1 %v435_v0 }
 0x50a   :  { %v541_v24 = vpop.f32.mrb[4].mxu1 }
 0x50b   :  { %v542_v25 = vadd.f32 %v591_v23, %v541_v24  ;;  %v693_v26 = vpop.f32.mrb[5].mxu1 }
 0x50c   :  { %v544_v27 = vpop.f32.mrb[6].mxu1 }
 0x50d   :  { %548 = vst [vmem:[#allocation11] sm:$0xff] %v542_v25  ;;  %v545_v28 = vadd.f32 %v591_v23, %v544_v27  ;;  %v694_v29 = vpop.f32.mrb[7].mxu1 }
 0x50f   :  { %549 = vst [vmem:[#allocation11 + $0x8] sm:$0xff] %v545_v28 }
 0x510   :  { %862 = shalt.err (!%p859_p2)
}
 0x511   :  { %s863_s1 = scalar_lea.hbm %s1098_s9, 256 }
 0x512   :  { %p864_p3 = scmp.ne.s32.totalorder %s1098_s9, %s863_s1  ;;  %p867_p4 = scmp.lt.u32.totalorder %s863_s1, %s1098_s9 }
 0x514   :  { %p869_p5 = pnand %p867_p4, %p864_p3 }
 0x516   :  { %872 = shalt.err (!%p869_p5)
}
 0x517   :  { %s891_s16 = smov 128   ;;  %s892_s18 = smov 8  }
 0x518   :  { %561 = dma.vmem_to_hbm [thread:$0]  %s556_s30, 256, %s1098_s9, [#allocation4], %s891_s16, %s891_s16, %s892_s18  }
 0x519   :  { %879 = dma.done.wait [#allocation4], 256  }
 0x51a   :  { %880 = vsyncadd [#allocation4], 4294967040 }
 0x51b   :  { %565 = vsyncpa [#allocation3], 1 }
 0x51c   :  { %566 = vsyncpa [#allocation6], 1 }
 0x51d   :  { %567 = vsyncpa [#allocation9], 1 }
 0x51e   :  { %568 = vsyncpa [#allocation4], 1 }

</bundles_post_ra>
